<compile_context>
chip_gen: v6e
topology: v6e:2x2x1
jax: 0.10.0
libtpu: 0.0.40
codegen_flags: <defaults>
</compile_context>

<pallas_src>
import jax
import jax.numpy as jnp
from jax.experimental import pallas as pl
from jax.experimental.pallas import tpu as pltpu


def _round_up(n: int, m: int) -> int:
    return ((n + m - 1) // m) * m


def _cdiv(a: int, b: int) -> int:
    return (a + b - 1) // b


def _head_matvec_kernel(x_ref, w_ref, b_ref, o_ref):
    # output_dim == 1 path: VPU multiply + lane reduction (no 1-column MXU pass).
    # x_ref: (TB, D)  w_ref: (1, D)  b_ref: (1, 1)  o_ref: (TB, 1)
    y = jnp.sum(x_ref[...] * w_ref[...], axis=-1, keepdims=True)
    o_ref[...] = (y + b_ref[...]).astype(o_ref.dtype)


def _head_matmul_kernel(x_ref, w_ref, b_ref, o_ref):
    # output_dim > 1 path: MXU matmul with f32 accumulation.
    # x_ref: (TB, D)  w_ref: (D, Op)  b_ref: (1, Op)  o_ref: (TB, Op)
    y = jnp.dot(x_ref[...], w_ref[...], preferred_element_type=jnp.float32)
    o_ref[...] = (y + b_ref[...]).astype(o_ref.dtype)


def _pick_tile_b(batch: int, d: int, itemsize: int) -> int:
    """Batch-tile rows: multiple of 8, VMEM-budgeted, balanced across tiles."""
    # Keep the double-buffered x tile under ~8 MiB so the pipeline fits every
    # generation's default scoped VMEM (v5e 16 MiB, v6e/v7x 32 MiB) with room
    # left for the resident weight/bias and the output tile.
    x_tile_budget = 8 << 20
    max_rows = (x_tile_budget // (2 * d * itemsize) // 8) * 8
    max_rows = max(8, min(4096, max_rows))
    n_tiles = max(1, _cdiv(batch, max_rows))
    # v7x shards a "parallel" grid axis across its 2 TensorCores; make sure
    # there are >= 2 grid steps whenever the batch is big enough to split.
    if n_tiles == 1 and batch > 8:
        n_tiles = 2
    # Balanced tiles keep padded/partial rows to < 8 per tile.
    tile_b = _round_up(_cdiv(batch, n_tiles), 8)
    if tile_b >= batch:
        tile_b = batch  # single exact tile (full-dim rule), zero padded rows
    return tile_b


def _vmem_limit_bytes(tile_b: int, d: int, o_cols: int, itemsize: int) -> int:
    o_lanes = _round_up(o_cols, 128)
    est = 2 * tile_b * d * itemsize                  # x (double-buffered)
    est += 2 * _round_up(d, 8) * o_lanes * itemsize  # weight (resident, 2 bufs)
    est += 2 * 8 * o_lanes * itemsize                # bias
    est += 2 * _round_up(tile_b, 8) * o_lanes * itemsize  # output tile
    est += 1 << 20                                   # Mosaic internal scratch slack
    # Never below any generation's default scoped limit; never above 32 MiB
    # (safe w.r.t. v7x's 64 MiB physical VMEM).
    return int(min(max(est, 16 << 20), 32 << 20))


def classification_head(x, weight_t, bias, output_dim):
    """ClassificationHead.forward (inference).

    x:        (B, S, D) activations.
    weight_t: (D, O)    nn.Linear weight, pre-transposed.
    bias:     (1, O)    nn.Linear bias.
    Returns (B,) if output_dim == 1 else (B, O).
    """
    B, S, D = x.shape
    assert weight_t.shape == (D, output_dim), weight_t.shape
    assert bias.shape == (1, output_dim), bias.shape
    # TODO(synk): dropout is identity at inference; training-mode dropout masks
    # are not implemented.

    itemsize = jnp.dtype(x.dtype).itemsize
    tile_b = _pick_tile_b(B, D, itemsize)
    grid = (_cdiv(B, tile_b),)

    # Last-token selection.  When D is 128-lane aligned, fuse it into the
    # kernel DMA: view x as (B, S*D) (free reshape) and point the x BlockSpec's
    # column block (width D) at block index S-1.  The kernel then reads only
    # the last token's features directly from HBM — no materialized slice, no
    # padded copy.  For unaligned (typically small) D, fall back to one strided
    # XLA slice; no padding is needed since the block's last dim equals the
    # full array dim.
    if D % 128 == 0:
        x_op = x.reshape(B, S * D)
        col_block = S - 1
    else:
        x_op = x[:, -1, :]
        col_block = 0
    x_spec = pl.BlockSpec((tile_b, D), lambda i, c=col_block: (i, c))

    compiler_params = pltpu.CompilerParams(
        dimension_semantics=("parallel",),
        vmem_limit_bytes=_vmem_limit_bytes(tile_b, D, output_dim, itemsize),
    )

    if output_dim == 1:
        w_row = weight_t.reshape(1, D)   # free reshape of (D, 1)
        b_sc = bias.reshape(1, 1)
        out = pl.pallas_call(
            _head_matvec_kernel,
            out_shape=jax.ShapeDtypeStruct((B, 1), x.dtype),
            grid=grid,
            in_specs=[
                x_spec,
                pl.BlockSpec((1, D), lambda i: (0, 0)),  # resident across tiles
                pl.BlockSpec((1, 1), lambda i: (0, 0)),  # resident across tiles
            ],
            out_specs=pl.BlockSpec((tile_b, 1), lambda i: (i, 0)),
            compiler_params=compiler_params,
        )(x_op, w_row, b_sc)
        return out[:, 0]  # matches torch .squeeze(-1)

    # Small class counts: pad O to a 128-lane multiple so output stores are
    # lane-dense/unmasked (padded columns are exact zeros, sliced off below).
    # TODO(synk): for very large output_dim (>= ~2K classes) add a second grid
    # axis over O blocks so the weight need not be fully VMEM-resident.
    o_pad = _round_up(output_dim, 128)
    if o_pad != output_dim:
        w_p = jnp.pad(weight_t, ((0, 0), (0, o_pad - output_dim)))
        b_p = jnp.pad(bias, ((0, 0), (0, o_pad - output_dim)))
    else:
        w_p, b_p = weight_t, bias

    out = pl.pallas_call(
        _head_matmul_kernel,
        out_shape=jax.ShapeDtypeStruct((B, o_pad), x.dtype),
        grid=grid,
        in_specs=[
            x_spec,
            pl.BlockSpec((D, o_pad), lambda i: (0, 0)),  # resident across tiles
            pl.BlockSpec((1, o_pad), lambda i: (0, 0)),  # resident across tiles
        ],
        out_specs=pl.BlockSpec((tile_b, o_pad), lambda i: (i, 0)),
        compiler_params=compiler_params,
    )(x_op, w_p, b_p)
    return out if o_pad == output_dim else out[:, :output_dim]


if __name__ == "__main__":
    key = jax.random.PRNGKey(0)
    kx_a, kx_b, kw, kb = jax.random.split(key, 4)

    batch, seq = 2, 8

    def make_params(d, o):
        bound = 1.0 / (d ** 0.5)
        w_t = jax.random.uniform(kw, (d, o), dtype=jnp.float32,
                                 minval=-bound, maxval=bound)
        b = jax.random.uniform(kb, (1, o), dtype=jnp.float32,
                               minval=-bound, maxval=bound)
        return w_t, b

    # D=32  -> unaligned-latent fallback path (wrapper last-token slice).
    # D=128 -> fused path (last-token selection folded into the x BlockSpec).
    for d, kxx in ((32, kx_a), (128, kx_b)):
        x = jax.random.normal(kxx, (batch, seq, d), dtype=jnp.float32)
        for o in (1, 3):
            w_t, b = make_params(d, o)
            out = jax.block_until_ready(classification_head(x, w_t, b, o))
            ref = x[:, -1, :] @ w_t + b
            ref = ref[:, 0] if o == 1 else ref
            assert out.shape == ref.shape, (d, o, out.shape, ref.shape)
            assert jnp.allclose(out, ref, atol=1e-4, rtol=1e-4), (d, o)

    print("KERNEL_OK")
</pallas_src>

<mosaic_0001>
module attributes {stable_mosaic.version = 11 : i64} {
  func.func @_head_matvec_kernel(%arg0: i32, %arg1: memref<2x32xf32, #tpu.memory_space<vmem>>, %arg2: memref<1x32xf32, #tpu.memory_space<vmem>>, %arg3: memref<1x1xf32, #tpu.memory_space<vmem>>, %arg4: memref<2x1xf32, #tpu.memory_space<vmem>>) attributes {dimension_semantics = [#tpu.dimension_semantics<parallel>], iteration_bounds = array<i64: 1>, scalar_prefetch = 0 : i64, scratch_operands = 0 : i64, tpu.core_type = #tpu.core_type<tc>, window_params = [{transform_indices = @transform_0, window_bounds = array<i64: 2, 32>}, {pipeline_mode = #tpu.pipeline_mode<synchronous>, transform_indices = @transform_1, window_bounds = array<i64: 1, 32>}, {pipeline_mode = #tpu.pipeline_mode<synchronous>, transform_indices = @transform_2, window_bounds = array<i64: 1, 1>}, {transform_indices = @transform_3, window_bounds = array<i64: 2, 1>}]} {
    %c0 = arith.constant 0 : index
    %c0_0 = arith.constant 0 : index
    %0 = vector.load %arg1[%c0, %c0_0] : memref<2x32xf32, #tpu.memory_space<vmem>>, vector<2x32xf32>
    %c0_1 = arith.constant 0 : index
    %c0_2 = arith.constant 0 : index
    %1 = vector.load %arg2[%c0_1, %c0_2] : memref<1x32xf32, #tpu.memory_space<vmem>>, vector<1x32xf32>
    %2 = vector.broadcast %1 : vector<1x32xf32> to vector<2x32xf32>
    %3 = arith.mulf %0, %2 : vector<2x32xf32>
    %cst = arith.constant dense<0.000000e+00> : vector<2xf32>
    %4 = vector.multi_reduction <add>, %3, %cst [1] : vector<2x32xf32> to vector<2xf32>
    %5 = vector.shape_cast %4 : vector<2xf32> to vector<2x1xf32>
    %c0_3 = arith.constant 0 : index
    %c0_4 = arith.constant 0 : index
    %6 = vector.load %arg3[%c0_3, %c0_4] : memref<1x1xf32, #tpu.memory_space<vmem>>, vector<1x1xf32>
    %7 = vector.broadcast %6 : vector<1x1xf32> to vector<2x1xf32>
    %8 = arith.addf %5, %7 : vector<2x1xf32>
    %c0_5 = arith.constant 0 : index
    %c0_6 = arith.constant 0 : index
    %9 = vector.load %arg4[%c0_5, %c0_6] : memref<2x1xf32, #tpu.memory_space<vmem>>, vector<2x1xf32>
    tpu.vector_store %arg4[%c0_5, %c0_6], %8 {strides = array<i32>} : memref<2x1xf32, #tpu.memory_space<vmem>>, vector<2x1xf32>,
    return
  }
  func.func @transform_0(%arg0: i32) -> (i32, i32) {
    %c0_i32 = arith.constant 0 : i32
    %c0_i32_0 = arith.constant 0 : i32
    return %arg0, %c0_i32 : i32, i32
  }
  func.func @transform_1(%arg0: i32) -> (i32, i32) {
    %c0_i32 = arith.constant 0 : i32
    %c0_i32_0 = arith.constant 0 : i32
    %c0_i32_1 = arith.constant 0 : i32
    return %c0_i32, %c0_i32_0 : i32, i32
  }
  func.func @transform_2(%arg0: i32) -> (i32, i32) {
    %c0_i32 = arith.constant 0 : i32
    %c0_i32_0 = arith.constant 0 : i32
    %c0_i32_1 = arith.constant 0 : i32
    return %c0_i32, %c0_i32_0 : i32, i32
  }
  func.func @transform_3(%arg0: i32) -> (i32, i32) {
    %c0_i32 = arith.constant 0 : i32
    %c0_i32_0 = arith.constant 0 : i32
    return %arg0, %c0_i32 : i32, i32
  }
}

</mosaic_0001>

<bundles_post_ra>
// kernel: tpu_custom_call.1
= control target key start
LH: loop header
LB: loop body
LE: loop exit
PB: predicated region body
PF: predicated region fallthrough
CT: control target
= control target key end

     0   :  { %vm25_vm0 = vcmask 254976   ;;  %vm37_vm1 = vcmask 1024   ;;  %s77_s0 = inlined_call_operand.vmem [shape: f32[2,32], index: 0, kind: input, shape index: {}]   ;;  %s78_s1 = inlined_call_operand.vmem [shape: f32[1,32], index: 1, kind: input, shape index: {}]   ;;  %s79_s2 = inlined_call_operand.<no memory space> [shape: f32[1,1], index: 2, kind: input, shape index: {}]   ;;  %s80_s3 = inlined_call_operand.vmem [shape: f32[2,1], index: 3, kind: output, shape index: {}]  }
   0x1   :  { %v16_v0 = vld [vmem:[%s77_s0] sm:$0x3]  ;;  %v8_v2 = vstv %s79_s2 }
   0x2   :  { %v43_v1 = vld [vmem:[%s78_s1] ss:$0 sm:$0xff]  ;;  %9 = vst [vmem:[#allocation2] sm:$0x1] %v8_v2 }
   0x3   :  { %v24_v3 = vmul.f32 %v43_v1, %v16_v0 }
   0x5   :  { %v26_v4 = vsel %vm25_vm0, %v24_v3, 0.0 }
   0x6   :  { %27 = vadd.xlane.f32.xlu0 %v26_v4 }
   0x9   :  { %v44_v5 = vld [vmem:[#allocation2] ss:$0 sm:$0xff] }
  0x8f   :  { %v28_v6 = vpop.xlane.xlu0 %27 }
  0x90   :  { %v36_v7 = vadd.f32 %v44_v5, %v28_v6 }
  0x92   :  { %38 = vst.msk [vmem:[%s80_s3] sm:$0x3] %vm37_vm1, %v36_v7 }

</bundles_post_ra>
